<compile_context>
chip_gen: v5e
topology: v5e:2x2
jax: 0.10.0
libtpu: 0.0.40
codegen_flags: <defaults>
</compile_context>

<pallas_src>
import jax
import jax.numpy as jnp
from jax import lax
from jax.experimental import pallas as pl
from jax.experimental.pallas import tpu as pltpu


def _round_up(x, m):
    return ((x + m - 1) // m) * m


# ----------------------------------------------------------------------------
# Path A: batched in-kernel gather + single MXU matmul per row tile.
# ----------------------------------------------------------------------------
def _gather_matmul_kernel(ids_ref, weight_hbm, wv_ref, o_ref, gbuf, sem):
    # ids_ref:    (N_pad,) int32 in SMEM (scalar prefetch)
    # weight_hbm: (num_doc, num_words) f32 in HBM (manual DMA)
    # wv_ref:     (num_words, d_pad) bf16, resident (constant block index)
    # o_ref:      (TM, d_pad) f32
    # gbuf:       (TM, num_words) f32 VMEM scratch for the gathered rows
    tm = gbuf.shape[0]
    base = pl.program_id(0) * tm

    def _issue(r, carry):
        row = ids_ref[base + r]
        pltpu.make_async_copy(weight_hbm.at[row], gbuf.at[r], sem).start()
        return carry

    lax.fori_loop(0, tm, _issue, 0)

    def _wait(r, carry):
        # Same-shaped descriptor as the corresponding start; waits one row.
        pltpu.make_async_copy(weight_hbm.at[0], gbuf.at[r], sem).wait()
        return carry

    lax.fori_loop(0, tm, _wait, 0)

    o_ref[...] = jnp.dot(
        gbuf[...].astype(jnp.bfloat16),
        wv_ref[...],
        preferred_element_type=jnp.float32,
    )


def _gather_matmul(doc_ids, weight, word_vectors, *, tm_max=256):
    n = doc_ids.shape[0]
    num_doc, num_words = weight.shape
    _, word_dim = word_vectors.shape

    tm = min(tm_max, _round_up(n, 8))
    n_pad = _round_up(n, tm)
    d_pad = _round_up(word_dim, 128)  # lane-dense output stores

    ids_p = jnp.pad(doc_ids, (0, n_pad - n))  # pad with id 0 (valid row)
    wv_p = jnp.pad(
        word_vectors, ((0, 0), (0, d_pad - word_dim))
    ).astype(jnp.bfloat16)

    grid_spec = pltpu.PrefetchScalarGridSpec(
        num_scalar_prefetch=1,
        grid=(n_pad // tm,),
        in_specs=[
            # Embedding table stays in HBM; rows DMA'd manually in-kernel.
            pl.BlockSpec(memory_space=pl.ANY),
            # Full word-vector matrix, same block every step (resident).
            pl.BlockSpec((num_words, d_pad), lambda i, ids: (0, 0)),
        ],
        out_specs=pl.BlockSpec((tm, d_pad), lambda i, ids: (i, 0)),
        scratch_shapes=[
            pltpu.VMEM((tm, num_words), jnp.float32),
            pltpu.SemaphoreType.DMA(()),
        ],
    )

    out = pl.pallas_call(
        _gather_matmul_kernel,
        out_shape=jax.ShapeDtypeStruct((n_pad, d_pad), jnp.float32),
        grid_spec=grid_spec,
        compiler_params=pltpu.CompilerParams(
            dimension_semantics=("parallel",)
        ),
    )(ids_p, weight, wv_p)
    return out[:n, :word_dim]


# ----------------------------------------------------------------------------
# Path B (N > num_doc): tiled matmul P = weight @ word_vectors, then gather P.
# ----------------------------------------------------------------------------
def _matmul_kernel(a_ref, b_ref, o_ref, acc_ref):
    @pl.when(pl.program_id(2) == 0)
    def _():
        acc_ref[...] = jnp.zeros_like(acc_ref)

    acc_ref[...] += jnp.dot(
        a_ref[...], b_ref[...], preferred_element_type=jnp.float32
    )

    @pl.when(pl.program_id(2) == pl.num_programs(2) - 1)
    def _():
        o_ref[...] = acc_ref[...].astype(o_ref.dtype)


def _matmul_bf16(a, b, *, tm_max=256, tn=128, tk_max=512):
    m, k = a.shape
    k2, n = b.shape
    assert k == k2

    tm = min(tm_max, _round_up(m, 8))
    tk = min(tk_max, _round_up(k, 128))
    m_pad = _round_up(m, tm)
    k_pad = _round_up(k, tk)
    n_pad = _round_up(n, tn)

    a_p = jnp.pad(a, ((0, m_pad - m), (0, k_pad - k))).astype(jnp.bfloat16)
    b_p = jnp.pad(b, ((0, k_pad - k), (0, n_pad - n))).astype(jnp.bfloat16)

    out = pl.pallas_call(
        _matmul_kernel,
        out_shape=jax.ShapeDtypeStruct((m_pad, n_pad), jnp.float32),
        grid_spec=pltpu.PrefetchScalarGridSpec(
            num_scalar_prefetch=0,
            grid=(m_pad // tm, n_pad // tn, k_pad // tk),
            in_specs=[
                pl.BlockSpec((tm, tk), lambda i, j, kk: (i, kk)),
                pl.BlockSpec((tk, tn), lambda i, j, kk: (kk, j)),
            ],
            out_specs=pl.BlockSpec((tm, tn), lambda i, j, kk: (i, j)),
            scratch_shapes=[pltpu.VMEM((tm, tn), jnp.float32)],
        ),
        compiler_params=pltpu.CompilerParams(
            dimension_semantics=("parallel", "parallel", "arbitrary")
        ),
    )(a_p, b_p)
    return out[:m, :n]


# ----------------------------------------------------------------------------
# Public forward: matches LR.forward(doc_ids, word_vectors).
# ----------------------------------------------------------------------------
def lr_forward(doc_ids, weight, word_vectors):
    n = doc_ids.shape[0]
    num_doc, num_words = weight.shape
    _, word_dim = word_vectors.shape
    del num_words, word_dim

    # Clamp ids so a bad id can never trigger an out-of-bounds DMA.
    doc_ids = jnp.clip(doc_ids.astype(jnp.int32), 0, num_doc - 1)

    if n > num_doc:
        # FLOPs drop by factor N/num_doc: one small matmul + trivial gather.
        p = _matmul_bf16(weight, word_vectors)      # (num_doc, word_dim) f32
        return jnp.take(p, doc_ids, axis=0)
    return _gather_matmul(doc_ids, weight, word_vectors)


if __name__ == "__main__":
    key = jax.random.PRNGKey(0)
    k1, k2, k3, k4 = jax.random.split(key, 4)

    num_doc, num_words, word_dim = 16, 128, 64

    # NOTE: the PyTorch module zero-initializes the embedding weight; we use a
    # deterministic random init so the kernel output is non-trivial.
    weight = jax.random.normal(k1, (num_doc, num_words), dtype=jnp.float32)
    word_vectors = jax.random.normal(k2, (num_words, word_dim), dtype=jnp.float32)

    # --- Path A: batched in-kernel gather + matmul (N <= num_doc) ---
    batch_a = 8
    doc_ids_a = jax.random.randint(k3, (batch_a,), 0, num_doc, dtype=jnp.int32)
    out_a = jax.block_until_ready(lr_forward(doc_ids_a, weight, word_vectors))
    ref_a = jnp.dot(
        weight[doc_ids_a].astype(jnp.bfloat16),
        word_vectors.astype(jnp.bfloat16),
        preferred_element_type=jnp.float32,
    )
    assert out_a.shape == (batch_a, word_dim), out_a.shape
    assert jnp.allclose(out_a, ref_a, atol=2e-2, rtol=2e-2), "path A mismatch"

    # --- Path B: precompute weight @ word_vectors, then gather (N > num_doc) ---
    batch_b = 48
    doc_ids_b = jax.random.randint(k4, (batch_b,), 0, num_doc, dtype=jnp.int32)
    out_b = jax.block_until_ready(lr_forward(doc_ids_b, weight, word_vectors))
    ref_b = jnp.dot(
        weight.astype(jnp.bfloat16),
        word_vectors.astype(jnp.bfloat16),
        preferred_element_type=jnp.float32,
    )[doc_ids_b]
    assert out_b.shape == (batch_b, word_dim), out_b.shape
    assert jnp.allclose(out_b, ref_b, atol=2e-2, rtol=2e-2), "path B mismatch"

    print("KERNEL_OK")
</pallas_src>

<mosaic_0001>
module attributes {stable_mosaic.version = 11 : i64} {
  func.func @_gather_matmul_kernel(%arg0: i32, %arg1: memref<8xi32, #tpu.memory_space<smem>>, %arg2: memref<16x128xf32, #tpu.memory_space<any>>, %arg3: memref<128x128xbf16, #tpu.memory_space<vmem>>, %arg4: memref<8x128xf32, #tpu.memory_space<vmem>>, %arg5: memref<8x128xf32, #tpu.memory_space<vmem>>, %arg6: memref<!tpu.dma_semaphore, #tpu.memory_space<semaphore_mem>>) attributes {dimension_semantics = [#tpu.dimension_semantics<parallel>], iteration_bounds = array<i64: 1>, scalar_prefetch = 1 : i64, scratch_operands = 2 : i64, tpu.core_type = #tpu.core_type<tc>, window_params = [{}, {pipeline_mode = #tpu.pipeline_mode<synchronous>, transform_indices = @transform_1, window_bounds = array<i64: 128, 128>}, {transform_indices = @transform_2, window_bounds = array<i64: 8, 128>}]} {
    %c8_i32 = arith.constant 8 : i32
    %0 = arith.muli %arg0, %c8_i32 : i32
    %c0_i32 = arith.constant 0 : i32
    %c8_i32_0 = arith.constant 8 : i32
    %1 = arith.addi %c0_i32, %c8_i32_0 : i32
    %c1_i32 = arith.constant 1 : i32
    scf.for %arg7 = %c0_i32 to %1 step %c1_i32  : i32 {
      %8 = arith.addi %0, %arg7 : i32
      %9 = arith.index_cast %8 : i32 to index
      %10 = memref.load %arg1[%9] : memref<8xi32, #tpu.memory_space<smem>>
      %c0_i32_11 = arith.constant 0 : i32
      %11 = tpu.memref_slice %arg2[%10, %c0_i32_11] : memref<16x128xf32, #tpu.memory_space<any>> -> memref<1x128xf32, #tpu.memory_space<any>>
      %12 = tpu.memref_squeeze %11 : memref<1x128xf32, #tpu.memory_space<any>> -> memref<128xf32, #tpu.memory_space<any>>
      %c0_i32_12 = arith.constant 0 : i32
      %13 = tpu.memref_slice %arg5[%arg7, %c0_i32_12] : memref<8x128xf32, #tpu.memory_space<vmem>> -> memref<1x128xf32, #tpu.memory_space<vmem>>
      %14 = tpu.memref_squeeze %13 : memref<1x128xf32, #tpu.memory_space<vmem>> -> memref<128xf32, #tpu.memory_space<vmem>>
      tpu.enqueue_dma source(%12 : memref<128xf32, #tpu.memory_space<any>>) target(%14 : memref<128xf32, #tpu.memory_space<vmem>>) target_semaphore(%arg6 : memref<!tpu.dma_semaphore, #tpu.memory_space<semaphore_mem>>)
    }
    %c8_i32_1 = arith.constant 8 : i32
    %c0_i32_2 = arith.constant 0 : i32
    %c8_i32_3 = arith.constant 8 : i32
    %2 = arith.addi %c0_i32_2, %c8_i32_3 : i32
    %c1_i32_4 = arith.constant 1 : i32
    scf.for %arg7 = %c0_i32_2 to %2 step %c1_i32_4  : i32 {
      %c0_i32_11 = arith.constant 0 : i32
      %c0_i32_12 = arith.constant 0 : i32
      %8 = tpu.memref_slice %arg2[%c0_i32_11, %c0_i32_12] : memref<16x128xf32, #tpu.memory_space<any>> -> memref<1x128xf32, #tpu.memory_space<any>>
      %9 = tpu.memref_squeeze %8 : memref<1x128xf32, #tpu.memory_space<any>> -> memref<128xf32, #tpu.memory_space<any>>
      %c0_i32_13 = arith.constant 0 : i32
      %10 = tpu.memref_slice %arg5[%arg7, %c0_i32_13] : memref<8x128xf32, #tpu.memory_space<vmem>> -> memref<1x128xf32, #tpu.memory_space<vmem>>
      %11 = tpu.memref_squeeze %10 : memref<1x128xf32, #tpu.memory_space<vmem>> -> memref<128xf32, #tpu.memory_space<vmem>>
      tpu.wait_dma2 semaphore(%arg6 : memref<!tpu.dma_semaphore, #tpu.memory_space<semaphore_mem>>) src(%9 : memref<128xf32, #tpu.memory_space<any>>) dst(%11 : memref<128xf32, #tpu.memory_space<vmem>>)
    }
    %c8_i32_5 = arith.constant 8 : i32
    %c0 = arith.constant 0 : index
    %c0_6 = arith.constant 0 : index
    %3 = vector.load %arg5[%c0, %c0_6] : memref<8x128xf32, #tpu.memory_space<vmem>>, vector<8x128xf32>
    %4 = arith.truncf %3 : vector<8x128xf32> to vector<8x128xbf16>
    %c0_7 = arith.constant 0 : index
    %c0_8 = arith.constant 0 : index
    %5 = vector.load %arg3[%c0_7, %c0_8] : memref<128x128xbf16, #tpu.memory_space<vmem>>, vector<128x128xbf16>
    %cst = arith.constant dense<0.000000e+00> : vector<8x128xf32>
    %6 = tpu.matmul %4, %5, %cst {dimension_numbers = #tpu.dot_dimension_numbers<[1], [0], [0], [1], [0, 0, 1, 1], [], []>} : vector<8x128xbf16>, vector<128x128xbf16>, vector<8x128xf32> -> vector<8x128xf32>
    %c0_9 = arith.constant 0 : index
    %c0_10 = arith.constant 0 : index
    %7 = vector.load %arg4[%c0_9, %c0_10] : memref<8x128xf32, #tpu.memory_space<vmem>>, vector<8x128xf32>
    tpu.vector_store %arg4[%c0_9, %c0_10], %6 {strides = array<i32>} : memref<8x128xf32, #tpu.memory_space<vmem>>, vector<8x128xf32>,
    return
  }
  func.func @transform_1(%arg0: i32, %arg1: memref<8xi32, #tpu.memory_space<smem>>) -> (i32, i32) {
    %c0_i32 = arith.constant 0 : i32
    %c0_i32_0 = arith.constant 0 : i32
    %c0_i32_1 = arith.constant 0 : i32
    return %c0_i32, %c0_i32_0 : i32, i32
  }
  func.func @transform_2(%arg0: i32, %arg1: memref<8xi32, #tpu.memory_space<smem>>) -> (i32, i32) {
    %c0_i32 = arith.constant 0 : i32
    %c0_i32_0 = arith.constant 0 : i32
    return %arg0, %c0_i32 : i32, i32
  }
}

</mosaic_0001>

<bundles_post_ra>
// kernel: tpu_custom_call.1
= control target key start
LH: loop header
LB: loop body
LE: loop exit
PB: predicated region body
PF: predicated region fallthrough
CT: control target
= control target key end

     0   :  { %s352_s15 = smov [#allocation5]   ;;  %s406_s0 = inlined_call_operand.hbm [shape: s32[8], index: 0, kind: input, shape index: {}]   ;;  %s407_s1 = inlined_call_operand.hbm [shape: f32[16,128], index: 1, kind: input, shape index: {}]   ;;  %s408_s2 = inlined_call_operand.hbm [shape: bf16[128,128], index: 2, kind: input, shape index: {}]   ;;  %s409_s3 = inlined_call_operand.hbm [shape: f32[8,128], index: 3, kind: output, shape index: {}]  }
   0x1   :  { %s9_s14 = sshll.u32 %s406_s0, 4  ;;  %s10_s14 = int_to_ptr.hbm [resolvable:$true] %s9_s14 }
   0x2   :  { %12 = dma.hbm_to_smem %s10_s14, 16, %s352_s15, [#allocation4] }
   0x3   :  { %336 = dma.done.wait [#allocation4], 16 }
   0x4   :  { %337 = vsyncadd [#allocation4], 4294967280 }
   0x5   :  { %15 = sfence }
   0x6   :  { %16 = vsyncpa [#allocation7], 0 }
   0x7   :  { %17 = vsyncpa [#allocation8], 0  ;;  %s22_s18 = sshll.u32 %s408_s2, 4  ;;  %s353_s19 = smov [#allocation6]   ;;  %s23_s18 = int_to_ptr.hbm [resolvable:$true] %s22_s18 }
   0x8   :  { %s24_s20 = sshll.u32 %s353_s19, 4  ;;  %s354_s21 = smov 64   ;;  %s25_s20 = int_to_ptr.vmem [resolvable:$true] %s24_s20 }
   0x9   :  { %s355_s22 = smov 4  }
   0xa   :  { %30 = dma.hbm_to_vmem [thread:$0]  %s23_s18, 1024, %s25_s20, [#allocation7], %s354_s21, %s354_s21, %s355_s22  }
   0xb   :  { %338 = dma.done.wait [#allocation7], 1024  }
   0xc   :  { %339 = vsyncadd [#allocation7], 4294966272  ;;  %s384_s0 = smov 0  }
   0xd LB: > { %s43_s23 = sld [smem:[#allocation5 + %s346_s0]]  ;;  %s45_s2 = scalar_lea.vmem [#allocation2], %s346_s0  ;;  %s346_s0 = sphi %s384_s0, %s41_s0  }
   0xe   : > { %s55_s24 = sshll.u32 %s45_s2, 4  ;;  %s284_s6 = scalar_lea.hbm %s407_s1, 16  ;;  %s56_s24 = int_to_ptr.vmem [resolvable:$true] %s55_s24 }
  0x13   : > { %s44_s27 = scalar_lea.hbm %s407_s1, %s43_s23 }
  0x14   : > { %s53_s28 = sshll.u32 %s44_s27, 4  ;;  %s54_s28 = int_to_ptr.hbm [resolvable:$true] %s53_s28 }
  0x15   : > { %s280_s29 = sshra.s32 %s54_s28, 4  ;;  %s281_s29 = int_to_ptr.hbm [resolvable:$true] %s280_s29 }
  0x16   : > { %s282_s30 = scalar_lea.hbm %s281_s29, 1  ;;  %p285_p1 = scmp.lt.s32.totalorder %s281_s29, %s407_s1 }
  0x17   : > { %p283_p0 = scmp.ne.s32.totalorder %s281_s29, %s282_s30  ;;  %p286_p2 = scmp.lt.s32.totalorder %s284_s6, %s282_s30 }
  0x19   : > { %p287_p3 = por %p286_p2, %p285_p1 }
  0x1b   : > { %p288_p4 = pnand %p287_p3, %p283_p0 }
  0x1d   : > { %291 = shalt.err (!%p288_p4)  }
  0x1e   : > { %s292_s9 = sshra.s32 %s56_s24, 4  ;;  %s356_s11 = smov [#allocation2]   ;;  %s293_s9 = int_to_ptr.vmem [resolvable:$true] %s292_s9 }
  0x1f   : > { %s294_s10 = scalar_lea.vmem %s293_s9, 1  ;;  %s296_s12 = scalar_lea.vmem %s356_s11, 8 }
  0x20   : > { %p295_p5 = scmp.ne.s32.totalorder %s293_s9, %s294_s10  ;;  %p297_p6 = scmp.lt.s32.totalorder %s293_s9, [#allocation2] }
  0x21   : > { %p298_p7 = scmp.lt.s32.totalorder %s296_s12, %s294_s10 }
  0x23   : > { %p299_p8 = por %p298_p7, %p297_p6 }
  0x25   : > { %p300_p9 = pnand %p299_p8, %p295_p5 }
  0x27   : > { %303 = shalt.err (!%p300_p9)  }
  0x28   : > { %58 = dma.hbm_to_vmem [thread:$0]  %s54_s28, 16, %s56_s24, [#allocation3] }
  0x29   : > { %s41_s0 = sadd.s32 1, %s346_s0  }
  0x2a   : > { %p38_p10 = scmp.ge.s32.totalorder %s41_s0, 8  }
  0x2b   :  { %s348_s13 = smov (%p38_p10), 0  }
  0x2c   :  { %40 = sbr.rel (!%p38_p10) target bundleno = 13 (0xd), region = 48 }
  0x31 LB: > { %340 = dma.done.wait [#allocation3], 16  ;;  %s350_s13 = sphi %s348_s13, %s64_s13  }
  0x32   : > { %341 = vsyncadd [#allocation3], 4294967280  ;;  %s64_s13 = sadd.s32 1, %s350_s13  }
  0x33   : > { %p61_p11 = scmp.ge.s32.totalorder %s64_s13, 8  }
  0x34   :  { %v222_v0 = vld [vmem:[#allocation6 + $0x38] sm:$0xff] (%p61_p11)  ;;  %v221_v1 = vld [vmem:[#allocation6 + $0x30] sm:$0xff] (%p61_p11)  ;;  %v220_v2 = vld [vmem:[#allocation6 + $0x28] sm:$0xff] (%p61_p11)  ;;  %s357_s1 = smov (%p61_p11), [#allocation9]   ;;  %s154_s17 = sshll.u32 (%p61_p11), %s409_s3, 4  ;;  %s155_s17 = int_to_ptr.hbm [resolvable:$true] %s154_s17 }
  0x35   :  { %63 = sbr.rel (!%p61_p11) target bundleno = 49 (0x31), region = 59  ;;  %133 = vmatpush.bf16.msra.mxu0 (%p61_p11), %v222_v0  ;;  %v219_v3 = vld [vmem:[#allocation6 + $0x20] sm:$0xff] (%p61_p11)  ;;  %v218_v4 = vld [vmem:[#allocation6 + $0x18] sm:$0xff] (%p61_p11)  ;;  %v217_v5 = vld [vmem:[#allocation6 + $0x10] sm:$0xff] (%p61_p11)  ;;  %s152_s14 = sshll.u32 (%p61_p11), %s357_s1, 4  ;;  %s153_s14 = int_to_ptr.vmem [resolvable:$true] %s152_s14 }
  0x36   :  { %v216_v6 = vld [vmem:[#allocation6 + $0x8] sm:$0xff] (%p61_p11)  ;;  %v215_v7 = vld [vmem:[#allocation6] sm:$0xff] (%p61_p11)  ;;  %v67_v8 = vld [vmem:[#allocation2] sm:$0xff] (%p61_p11) }
  0x37   :  { %v68_v9 = vpack.c.bf16 (%p61_p11), %v67_v8, %v67_v8 }
  0x39   :  { %134 = vmatpush.bf16.msra.mxu0 (%p61_p11), %v221_v1 }
  0x3d   :  { %135 = vmatpush.bf16.msra.mxu0 %v220_v2 }
  0x41   :  { %136 = vmatpush.bf16.msra.mxu0 %v219_v3 }
  0x45   :  { %137 = vmatpush.bf16.msra.mxu0 %v218_v4 }
  0x49   :  { %138 = vmatpush.bf16.msra.mxu0 %v217_v5 }
  0x4d   :  { %139 = vmatpush.bf16.msra.mxu0 %v216_v6 }
  0x51   :  { %140 = vmatpush.bf16.msra.mxu0 %v215_v7 }
  0x54   :  { %141 = vmatmul.bf16.vlgmr.msra.gmra.mxu0 %v68_v9 }
  0xd1   :  { %v142_v10 = vpop.f32.mrf.mxu0 }
  0xd2   :  { %146 = vst [vmem:[#allocation9] sm:$0xff] %v142_v10 }
  0xd3   :  { %157 = dma.vmem_to_hbm [thread:$0]  %s153_s14, 128, %s155_s17, [#allocation8]  }
  0xd9   :  { %v144_v11 = vpop.f32.mrf.mxu0 }
  0xda   :  { %342 = dma.done.wait [#allocation8], 128  }
  0xdb   :  { %343 = vsyncadd [#allocation8], 4294967168 }
  0xdc   :  { %162 = vsyncpa [#allocation7], 1 }
  0xdd   :  { %163 = vsyncpa [#allocation8], 1 }
  0xde   :  { %164 = vsyncmov [#allocation3] }
  0xe1   :  { %s165_s18 = vpop.sfrf %164 }
  0xe2   :  { %p214_p12 = scmp.ne.s32.totalorder %s165_s18, 0 }
  0xe4   :  { %169 = shalt.err (%p214_p12)  }

</bundles_post_ra>
